<compile_context>
chip_gen: v7x
topology: tpu7x:2x2x1
jax: 0.10.0
libtpu: 0.0.40
codegen_flags: <defaults>
</compile_context>

<pallas_src>
import functools

import jax
import jax.numpy as jnp
from jax.experimental import pallas as pl
from jax.experimental.pallas import tpu as pltpu

ALPHA = 0.5
EPS = 1e-8  # nn.CosineSimilarity default eps


def _triplet_kernel(a_ref, p_ref, n_ref, o_ref, *, true_b, alpha, eps, needs_mask):
    a = a_ref[...].astype(jnp.float32)
    p = p_ref[...].astype(jnp.float32)
    n = n_ref[...].astype(jnp.float32)

    # per-row dot products and squared L2 norms (reduce over feature/lane axis)
    dot_ap = jnp.sum(a * p, axis=-1, keepdims=True)   # (TB, 1)
    dot_an = jnp.sum(a * n, axis=-1, keepdims=True)
    sq_a = jnp.sum(a * a, axis=-1, keepdims=True)
    sq_p = jnp.sum(p * p, axis=-1, keepdims=True)
    sq_n = jnp.sum(n * n, axis=-1, keepdims=True)

    # cosine similarity via rsqrt (EUP); eps^2 clamp == clamping the norm product
    eps2 = jnp.float32(eps * eps)
    s_d = dot_ap * jax.lax.rsqrt(jnp.maximum(sq_a * sq_p, eps2))
    n_d = dot_an * jax.lax.rsqrt(jnp.maximum(sq_a * sq_n, eps2))

    per_sample = jnp.maximum(n_d - s_d + jnp.float32(alpha), 0.0)   # (TB, 1)

    if needs_mask:
        # mask rows of the final (partial) tile that fall past the true batch;
        # OOB reads of a partial boundary block may contain garbage.
        tb = a_ref.shape[0]
        row = (pl.program_id(0) * tb
               + jax.lax.broadcasted_iota(jnp.int32, (tb, 1), 0))
        per_sample = jnp.where(row < true_b, per_sample, 0.0)

    tile_sum = jnp.sum(per_sample, axis=0, keepdims=True)           # (1, 1)
    # write this tile's partial sum as a lane-dense (8, 128) block
    o_ref[...] = jnp.broadcast_to(tile_sum, o_ref.shape)


def _pick_batch_tile(B, D, itemsize):
    # 3 inputs x 2 pipeline buffers x TB x D x itemsize  ~<= 16 MiB
    budget = 16 * 1024 * 1024
    tb = budget // (6 * D * itemsize)
    tb = max(8, (tb // 8) * 8)
    tb = min(tb, 2048)
    return tb


def triplet_loss(a_x, p_x, n_x, *, alpha=ALPHA, batch_tile=None):
    assert a_x.shape == p_x.shape == n_x.shape
    assert a_x.ndim == 2
    B, D = a_x.shape
    itemsize = jnp.dtype(a_x.dtype).itemsize

    tb = _pick_batch_tile(B, D, itemsize) if batch_tile is None else batch_tile
    if B <= tb:
        tb = B          # single full-batch tile (any B allowed when block == array dim)
    n_tiles = pl.cdiv(B, tb)
    needs_mask = (B % tb) != 0

    kernel = functools.partial(
        _triplet_kernel,
        true_b=B,
        alpha=alpha,
        eps=EPS,
        needs_mask=needs_mask,
    )

    in_spec = pl.BlockSpec((tb, D), lambda i: (i, 0))
    out_spec = pl.BlockSpec((1, 8, 128), lambda i: (i, 0, 0))

    partials = pl.pallas_call(
        kernel,
        out_shape=jax.ShapeDtypeStruct((n_tiles, 8, 128), jnp.float32),
        grid=(n_tiles,),
        in_specs=[in_spec, in_spec, in_spec],
        out_specs=out_spec,
        compiler_params=pltpu.CompilerParams(
            dimension_semantics=("parallel",),
            vmem_limit_bytes=40 * 1024 * 1024,
        ),
    )(a_x, p_x, n_x)

    return jnp.sum(partials[:, 0, 0]) / jnp.float32(B)


def triplet_loss_ref(a_x, p_x, n_x, alpha=ALPHA):
    def cos(x1, x2):
        num = jnp.sum(x1 * x2, axis=1)
        den = jnp.maximum(
            jnp.linalg.norm(x1, axis=1) * jnp.linalg.norm(x2, axis=1), EPS
        )
        return num / den

    s_d = cos(a_x, p_x)
    n_d = cos(a_x, n_x)
    return jnp.mean(jnp.maximum(n_d - s_d + alpha, 0.0))


if __name__ == "__main__":
    key = jax.random.PRNGKey(0)
    k1, k2, k3 = jax.random.split(key, 3)

    # primary small case: (batch, feature) embedding triplets
    B, D = 8, 32
    a_x = jax.random.normal(k1, (B, D), dtype=jnp.float32)
    p_x = jax.random.normal(k2, (B, D), dtype=jnp.float32)
    n_x = jax.random.normal(k3, (B, D), dtype=jnp.float32)

    out = triplet_loss(a_x, p_x, n_x)
    jax.block_until_ready(out)
    ref = triplet_loss_ref(a_x, p_x, n_x)
    assert jnp.allclose(out, ref, atol=1e-5, rtol=1e-5), (out, ref)

    # multi-tile path: non-multiple batch exercises the cdiv grid, the partial
    # boundary block, and the in-kernel row masking (no wrapper-side padding).
    B2, D2 = 20, 32
    k4, k5, k6 = jax.random.split(k3, 3)
    a2 = jax.random.normal(k4, (B2, D2), dtype=jnp.float32)
    p2 = jax.random.normal(k5, (B2, D2), dtype=jnp.float32)
    n2 = jax.random.normal(k6, (B2, D2), dtype=jnp.float32)

    out2 = triplet_loss(a2, p2, n2, batch_tile=8)
    jax.block_until_ready(out2)
    ref2 = triplet_loss_ref(a2, p2, n2)
    assert jnp.allclose(out2, ref2, atol=1e-5, rtol=1e-5), (out2, ref2)

    print("KERNEL_OK")
</pallas_src>

<mosaic_0001>
module attributes {stable_mosaic.version = 11 : i64} {
  func.func @_triplet_kernel(%arg0: i32, %arg1: memref<8x32xf32, #tpu.memory_space<vmem>>, %arg2: memref<8x32xf32, #tpu.memory_space<vmem>>, %arg3: memref<8x32xf32, #tpu.memory_space<vmem>>, %arg4: memref<1x8x128xf32, #tpu.memory_space<vmem>>) attributes {dimension_semantics = [#tpu.dimension_semantics<parallel>], iteration_bounds = array<i64: 1>, scalar_prefetch = 0 : i64, scratch_operands = 0 : i64, tpu.core_type = #tpu.core_type<tc>, window_params = [{transform_indices = @transform_0, window_bounds = array<i64: 8, 32>}, {transform_indices = @transform_1, window_bounds = array<i64: 8, 32>}, {transform_indices = @transform_2, window_bounds = array<i64: 8, 32>}, {transform_indices = @transform_3, window_bounds = array<i64: 1, 8, 128>}]} {
    %c0 = arith.constant 0 : index
    %c0_0 = arith.constant 0 : index
    %0 = vector.load %arg1[%c0, %c0_0] : memref<8x32xf32, #tpu.memory_space<vmem>>, vector<8x32xf32>
    %c0_1 = arith.constant 0 : index
    %c0_2 = arith.constant 0 : index
    %1 = vector.load %arg2[%c0_1, %c0_2] : memref<8x32xf32, #tpu.memory_space<vmem>>, vector<8x32xf32>
    %c0_3 = arith.constant 0 : index
    %c0_4 = arith.constant 0 : index
    %2 = vector.load %arg3[%c0_3, %c0_4] : memref<8x32xf32, #tpu.memory_space<vmem>>, vector<8x32xf32>
    %3 = arith.mulf %0, %1 : vector<8x32xf32>
    %cst = arith.constant dense<0.000000e+00> : vector<8xf32>
    %4 = vector.multi_reduction <add>, %3, %cst [1] : vector<8x32xf32> to vector<8xf32>
    %5 = vector.shape_cast %4 : vector<8xf32> to vector<8x1xf32>
    %6 = arith.mulf %0, %2 : vector<8x32xf32>
    %cst_5 = arith.constant dense<0.000000e+00> : vector<8xf32>
    %7 = vector.multi_reduction <add>, %6, %cst_5 [1] : vector<8x32xf32> to vector<8xf32>
    %8 = vector.shape_cast %7 : vector<8xf32> to vector<8x1xf32>
    %9 = arith.mulf %0, %0 : vector<8x32xf32>
    %cst_6 = arith.constant dense<0.000000e+00> : vector<8xf32>
    %10 = vector.multi_reduction <add>, %9, %cst_6 [1] : vector<8x32xf32> to vector<8xf32>
    %11 = vector.shape_cast %10 : vector<8xf32> to vector<8x1xf32>
    %12 = arith.mulf %1, %1 : vector<8x32xf32>
    %cst_7 = arith.constant dense<0.000000e+00> : vector<8xf32>
    %13 = vector.multi_reduction <add>, %12, %cst_7 [1] : vector<8x32xf32> to vector<8xf32>
    %14 = vector.shape_cast %13 : vector<8xf32> to vector<8x1xf32>
    %15 = arith.mulf %2, %2 : vector<8x32xf32>
    %cst_8 = arith.constant dense<0.000000e+00> : vector<8xf32>
    %16 = vector.multi_reduction <add>, %15, %cst_8 [1] : vector<8x32xf32> to vector<8xf32>
    %17 = vector.shape_cast %16 : vector<8xf32> to vector<8x1xf32>
    %18 = arith.mulf %11, %14 : vector<8x1xf32>
    %cst_9 = arith.constant 1.000000e-16 : f32
    %19 = vector.broadcast %cst_9 : f32 to vector<8x1xf32>
    %20 = arith.maximumf %18, %19 : vector<8x1xf32>
    %21 = math.rsqrt %20 : vector<8x1xf32>
    %22 = arith.mulf %5, %21 : vector<8x1xf32>
    %23 = arith.mulf %11, %17 : vector<8x1xf32>
    %cst_10 = arith.constant 1.000000e-16 : f32
    %24 = vector.broadcast %cst_10 : f32 to vector<8x1xf32>
    %25 = arith.maximumf %23, %24 : vector<8x1xf32>
    %26 = math.rsqrt %25 : vector<8x1xf32>
    %27 = arith.mulf %8, %26 : vector<8x1xf32>
    %28 = arith.subf %27, %22 : vector<8x1xf32>
    %cst_11 = arith.constant 5.000000e-01 : f32
    %29 = vector.broadcast %cst_11 : f32 to vector<8x1xf32>
    %30 = arith.addf %28, %29 : vector<8x1xf32>
    %cst_12 = arith.constant 0.000000e+00 : f32
    %31 = vector.broadcast %cst_12 : f32 to vector<8x1xf32>
    %32 = arith.maximumf %30, %31 : vector<8x1xf32>
    %cst_13 = arith.constant dense<0.000000e+00> : vector<1xf32>
    %33 = vector.multi_reduction <add>, %32, %cst_13 [0] : vector<8x1xf32> to vector<1xf32>
    %34 = vector.shape_cast %33 : vector<1xf32> to vector<1x1xf32>
    %35 = vector.shape_cast %34 : vector<1x1xf32> to vector<1x1x1xf32>
    %36 = vector.broadcast %35 : vector<1x1x1xf32> to vector<1x8x128xf32>
    %c0_14 = arith.constant 0 : index
    %c0_15 = arith.constant 0 : index
    %c0_16 = arith.constant 0 : index
    %37 = vector.load %arg4[%c0_14, %c0_15, %c0_16] : memref<1x8x128xf32, #tpu.memory_space<vmem>>, vector<1x8x128xf32>
    tpu.vector_store %arg4[%c0_14, %c0_15, %c0_16], %36 {strides = array<i32>} : memref<1x8x128xf32, #tpu.memory_space<vmem>>, vector<1x8x128xf32>,
    return
  }
  func.func @transform_0(%arg0: i32) -> (i32, i32) {
    %c0_i32 = arith.constant 0 : i32
    %c0_i32_0 = arith.constant 0 : i32
    return %arg0, %c0_i32 : i32, i32
  }
  func.func @transform_1(%arg0: i32) -> (i32, i32) {
    %c0_i32 = arith.constant 0 : i32
    %c0_i32_0 = arith.constant 0 : i32
    return %arg0, %c0_i32 : i32, i32
  }
  func.func @transform_2(%arg0: i32) -> (i32, i32) {
    %c0_i32 = arith.constant 0 : i32
    %c0_i32_0 = arith.constant 0 : i32
    return %arg0, %c0_i32 : i32, i32
  }
  func.func @transform_3(%arg0: i32) -> (i32, i32, i32) {
    %c0_i32 = arith.constant 0 : i32
    %c0_i32_0 = arith.constant 0 : i32
    %c0_i32_1 = arith.constant 0 : i32
    return %arg0, %c0_i32, %c0_i32_0 : i32, i32, i32
  }
}

</mosaic_0001>

<bundles_post_ra>
// kernel: tpu_custom_call.1
= control target key start
LH: loop header
LB: loop body
LE: loop exit
PB: predicated region body
PF: predicated region fallthrough
CT: control target
= control target key end

     0   :  { %8 = vsyncpa [#allocation3], 0  ;;  %s287_s0 = inlined_call_operand.hbm [shape: f32[8,32], index: 0, kind: input, shape index: {}]   ;;  %s288_s1 = inlined_call_operand.hbm [shape: f32[8,32], index: 1, kind: input, shape index: {}]   ;;  %s289_s2 = inlined_call_operand.hbm [shape: f32[8,32], index: 2, kind: input, shape index: {}]   ;;  %s290_s3 = inlined_call_operand.hbm [shape: f32[1,8,128], index: 3, kind: output, shape index: {}]  }
   0x1   :  { %9 = vsyncpa [#allocation6], 0 }
   0x2   :  { %10 = vsyncpa [#allocation4], 0  ;;  %s210_s12 = smov [#allocation5]   ;;  %s211_s14 = smov [#allocation2]  }
   0x3   :  { %s27_s13 = sshll.u32 %s210_s12, 4  ;;  %s17_s15 = sshll.u32 %s211_s14, 4  ;;  %s28_s13 = int_to_ptr.vmem [resolvable:$true] %s27_s13  ;;  %s18_s15 = int_to_ptr.vmem [resolvable:$true] %s17_s15 }
   0x4   :  { %s116_s18 = scalar_lea.hbm %s288_s1, 128 }
   0x5   :  { %p117_p0 = scmp.ne.s32.totalorder %s288_s1, %s116_s18  ;;  %p120_p1 = scmp.lt.u32.totalorder %s116_s18, %s288_s1 }
   0x7   :  { %p122_p2 = pnand %p120_p1, %p117_p0 }
   0x9   :  { %125 = shalt.err (!%p122_p2)
}
   0xa   :  { %s126_s23 = scalar_lea.vmem %s28_s13, 128  ;;  %p131_p4 = scmp.lt.s32.totalorder %s28_s13, %s28_s13 }
   0xb   :  { %p127_p3 = scmp.ne.s32.totalorder %s28_s13, %s126_s23  ;;  %p132_p5 = scmp.lt.s32.totalorder %s126_s23, %s126_s23 }
   0xd   :  { %p133_p6 = por %p132_p5, %p131_p4 }
   0xf   :  { %p134_p7 = pnand %p133_p6, %p127_p3 }
  0x11   :  { %137 = shalt.err (!%p134_p7)
}
  0x12   :  { %30 = dma.hbm_to_vmem [thread:$0]  %s288_s1, 128, %s28_s13, [#allocation6]  }
  0x13   :  { %s138_s28 = scalar_lea.hbm %s287_s0, 128 }
  0x14   :  { %p139_p8 = scmp.ne.s32.totalorder %s287_s0, %s138_s28  ;;  %p142_p9 = scmp.lt.u32.totalorder %s138_s28, %s287_s0 }
  0x16   :  { %p144_p10 = pnand %p142_p9, %p139_p8 }
  0x18   :  { %147 = shalt.err (!%p144_p10)
}
  0x19   :  { %s148_s6 = scalar_lea.vmem %s18_s15, 128  ;;  %p153_p12 = scmp.lt.s32.totalorder %s18_s15, %s18_s15 }
  0x1a   :  { %p149_p11 = scmp.ne.s32.totalorder %s18_s15, %s148_s6  ;;  %p154_p13 = scmp.lt.s32.totalorder %s148_s6, %s148_s6 }
  0x1c   :  { %p155_p0 = por %p154_p13, %p153_p12 }
  0x1e   :  { %p156_p1 = pnand %p155_p0, %p149_p11 }
  0x20   :  { %159 = shalt.err (!%p156_p1)
}
  0x21   :  { %20 = dma.hbm_to_vmem [thread:$0]  %s287_s0, 128, %s18_s15, [#allocation3]  }
  0x22   :  { %s212_s8 = smov [#allocation7]   ;;  %s160_s12 = scalar_lea.hbm %s289_s2, 128 }
  0x23   :  { %s37_s9 = sshll.u32 %s212_s8, 4  ;;  %p161_p2 = scmp.ne.s32.totalorder %s289_s2, %s160_s12  ;;  %s38_s9 = int_to_ptr.vmem [resolvable:$true] %s37_s9 }
  0x24   :  { %p164_p3 = scmp.lt.u32.totalorder %s160_s12, %s289_s2 }
  0x26   :  { %p166_p4 = pnand %p164_p3, %p161_p2 }
  0x28   :  { %169 = shalt.err (!%p166_p4)
}
  0x29   :  { %s170_s18 = scalar_lea.vmem %s38_s9, 128  ;;  %p175_p6 = scmp.lt.s32.totalorder %s38_s9, %s38_s9 }
  0x2a   :  { %p171_p5 = scmp.ne.s32.totalorder %s38_s9, %s170_s18  ;;  %p176_p7 = scmp.lt.s32.totalorder %s170_s18, %s170_s18 }
  0x2c   :  { %p177_p8 = por %p176_p7, %p175_p6 }
  0x2e   :  { %p178_p9 = pnand %p177_p8, %p171_p5 }
  0x30   :  { %181 = shalt.err (!%p178_p9)
}
  0x31   :  { %40 = dma.hbm_to_vmem [thread:$0]  %s289_s2, 128, %s38_s9, [#allocation6]  }
  0x32   :  { %204 = dma.done.wait [#allocation3], 128  }
  0x33   :  { %205 = vsyncadd [#allocation3], 4294967168 }
  0x34   :  { %206 = dma.done.wait [#allocation6], 256  }
  0x35   :  { %207 = vsyncadd [#allocation6], 4294967040  ;;  %v52_v0 = vld [vmem:[#allocation7] sm:$0xff]  ;;  %vm54_vm0 = vcmask 261120   ;;  %v50_v1 = vld [vmem:[#allocation2] sm:$0xff]  ;;  %s213_s2 = smov [#allocation8]  }
  0x36   :  { %v51_v2 = vld [vmem:[#allocation5] sm:$0xff]  ;;  %v70_v3 = vmul.f32 %v52_v0, %v52_v0  ;;  %v62_v4 = vmul.f32 %v50_v1, %v50_v1  ;;  %v58_v10 = vmul.f32 %v52_v0, %v50_v1  ;;  %s98_s19 = sshll.u32 %s213_s2, 4  ;;  %s99_s19 = int_to_ptr.vmem [resolvable:$true] %s98_s19 }
  0x37   :  { %v66_v5 = vmul.f32 %v51_v2, %v51_v2  ;;  %v53_v6 = vmul.f32 %v51_v2, %v50_v1  ;;  %s182_s20 = scalar_lea.vmem %s99_s19, 128  ;;  %p187_p11 = scmp.lt.s32.totalorder %s99_s19, %s99_s19 }
  0x38   :  { %v71_v7 = vsel %vm54_vm0, %v70_v3, 0.0  ;;  %v63_v8 = vsel %vm54_vm0, %v62_v4, 0.0  ;;  %v59_v12 = vsel %vm54_vm0, %v58_v10, 0.0  ;;  %p183_p10 = scmp.ne.s32.totalorder %s99_s19, %s182_s20  ;;  %p188_p12 = scmp.lt.s32.totalorder %s182_s20, %s182_s20 }
  0x39   :  { %72 = vadd.xlane.f32.xlu1 %v71_v7  ;;  %64 = vadd.xlane.f32.xlu0 %v63_v8  ;;  %v67_v9 = vsel %vm54_vm0, %v66_v5, 0.0  ;;  %v55_v11 = vsel %vm54_vm0, %v53_v6, 0.0 }
  0x3a   :  { %p189_p13 = por %p188_p12, %p187_p11 }
  0x3c   :  { %p190_p0 = pnand %p189_p13, %p183_p10 }
  0x3d   :  { %68 = vadd.xlane.f32.xlu0 %v67_v9  ;;  %56 = vadd.xlane.f32.xlu1 %v55_v11 }
  0x41   :  { %60 = vadd.xlane.f32.xlu0 %v59_v12 }
  0xc6   :  { %v73_v13 = vpop.xlane.xlu1 %72  ;;  %v65_v14 = vpop.xlane.xlu0 %64 }
  0xc7   :  { %v78_v15 = vmul.f32 %v73_v13, %v65_v14 }
  0xc9   :  { %v79_v16 = vmax.f32 %v78_v15, 1e-16 }
  0xca   :  { %v69_v17 = vpop.xlane.xlu0 %68  ;;  %v57_v22 = vpop.xlane.xlu1 %56 }
  0xcb   :  { %v74_v18 = vmul.f32 %v69_v17, %v65_v14  ;;  %112 = vrsqrt.f32 %v79_v16 }
  0xcd   :  { %v75_v19 = vmax.f32 %v74_v18, 1e-16 }
  0xce   :  { %v61_v21 = vpop.xlane.xlu0 %60 }
  0xcf   :  { %114 = vrsqrt.f32 %v75_v19 }
  0xd5   :  { %v113_v20 = vpop.eup %112 }
  0xd6   :  { %v81_v24 = vmul.f32 %v113_v20, %v61_v21 }
  0xd9   :  { %v115_v23 = vpop.eup %114 }
  0xda   :  { %v77_v25 = vmul.f32 %v115_v23, %v57_v22 }
  0xdc   :  { %v82_v26 = vsub.f32 %v81_v24, %v77_v25 }
  0xde   :  { %v83_v27 = vadd.f32 0.5, %v82_v26 }
  0xe0   :  { %v84_v28 = vmax.f32 %v83_v27, 0.0 }
  0xe2   :  { %v85_v29 = vrot.slane %v84_v28, 4 }
  0xe4   :  { %v86_v30 = vadd.f32 %v85_v29, %v84_v28 }
  0xe6   :  { %v87_v31 = vrot.slane %v86_v30, 2 }
  0xe8   :  { %v88_v32 = vadd.f32 %v87_v31, %v86_v30 }
  0xea   :  { %v89_v33 = vrot.slane %v88_v32, 1 }
  0xec   :  { %v90_v34 = vadd.f32 %v89_v33, %v88_v32 }
  0xee   :  { %91 = vst [vmem:[#allocation8] sm:$0xff] %v90_v34 }
  0xef   :  { %193 = shalt.err (!%p190_p0)
}
  0xf0   :  { %s194_s23 = scalar_lea.hbm %s290_s3, 128 }
  0xf1   :  { %p195_p1 = scmp.ne.s32.totalorder %s290_s3, %s194_s23  ;;  %p198_p2 = scmp.lt.u32.totalorder %s194_s23, %s290_s3 }
  0xf3   :  { %p200_p3 = pnand %p198_p2, %p195_p1 }
  0xf5   :  { %203 = shalt.err (!%p200_p3)
}
  0xf6   :  { %101 = dma.vmem_to_hbm [thread:$0]  %s99_s19, 128, %s290_s3, [#allocation4]  }
  0xf7   :  { %208 = dma.done.wait [#allocation4], 128  }
  0xf8   :  { %209 = vsyncadd [#allocation4], 4294967168 }
  0xf9   :  { %105 = vsyncpa [#allocation3], 1 }
  0xfa   :  { %106 = vsyncpa [#allocation6], 1 }
  0xfb   :  { %107 = vsyncpa [#allocation4], 1 }

</bundles_post_ra>
